<compile_context>
chip_gen: v7x
topology: tpu7x:2x2x1
jax: 0.10.0
libtpu: 0.0.40
codegen_flags: <defaults>
</compile_context>

<pallas_src>
import math

import jax
import jax.numpy as jnp
from jax.experimental import pallas as pl
from jax.experimental.pallas import tpu as pltpu


def _classifier_kernel(z_ref, c_ref,
                       we_ref, be_ref,
                       w1_ref, b1_ref,
                       w2_ref, b2_ref,
                       o_ref, acc_ref):
    # z_ref : (TB, TK)  f32   flattened atom latent (batch tile, K slice)
    # c_ref : (TB, 3)   f32   coordinates
    # we_ref: (3, TK)   f32   coord-embedding weight slice ; be_ref: (1, TK) f32
    # w1_ref: (TK, H)   bf16  ; b1_ref: (1, H)   f32
    # w2_ref: (H, NCP)  bf16  (lane-padded head) ; b2_ref: (1, NCP) f32
    # o_ref : (TB, NCP) f32   ; acc_ref: (TB, H) f32 scratch accumulator
    k = pl.program_id(1)

    @pl.when(k == 0)
    def _():
        acc_ref[...] = jnp.zeros_like(acc_ref)

    # embed_coords: Linear(3 -> F), restricted to this K slice, done as 3
    # broadcast FMAs on the VPU (no MXU push/pop for a 3-deep contraction).
    c = c_ref[...]
    we = we_ref[...]
    z_coords = (c[:, 0:1] * we[0:1, :]
                + c[:, 1:2] * we[1:2, :]
                + c[:, 2:3] * we[2:3, :]
                + be_ref[...])

    # residual combine in f32 (z stream arrives in its native f32), single
    # bf16 cast right before the MXU.
    h = (z_ref[...] + z_coords).astype(jnp.bfloat16)

    # first mlp Linear, accumulated over K slices in f32.
    acc_ref[...] += jnp.dot(h, w1_ref[...], preferred_element_type=jnp.float32)

    @pl.when(k == pl.num_programs(1) - 1)
    def _():
        h1 = jnp.maximum(acc_ref[...] + b1_ref[...], 0.0)
        logits = jnp.dot(h1.astype(jnp.bfloat16), w2_ref[...],
                         preferred_element_type=jnp.float32) + b2_ref[...]
        o_ref[...] = logits


def _choose_tb(B):
    """Batch tile: >= 2 grid steps whenever possible, 8-aligned, MXU-friendly."""
    if B >= 512:
        return 256
    if B >= 16:
        return max(8, ((B // 2) // 8) * 8)
    return B            # tiny batches: one block equal to the full batch dim


def _choose_tk(F, max_tk=1024):
    """K (feature) tile: must divide F exactly (garbage in OOB K padding would
    contaminate the contraction) and be a multiple of 128 for the lane rule."""
    if F <= max_tk:
        return F
    if F % 128 != 0:
        return F        # TODO(synk): mask the tail K slice to allow tiling for F not %128
    tk = max_tk - (max_tk % 128)
    while tk >= 128:
        if F % tk == 0:
            return tk
        tk -= 128
    return F


def coordinate_classifier_forward(z_atoms, x_coords, params):
    """z_atoms: (B, C, D, H, W) float32 ; x_coords: (B, 3) float32."""
    B = z_atoms.shape[0]
    F = math.prod(z_atoms.shape[1:])          # static python int

    # Flatten (row-major, identical to torch.nn.Flatten on NCDHW).
    # NOTE: kept in f32 — the bf16 cast happens per-tile inside the kernel.
    z_flat = z_atoms.reshape(B, F).astype(jnp.float32)
    coords = x_coords.astype(jnp.float32)

    we = params["we"].astype(jnp.float32)     # (3, F)
    be = params["be"].astype(jnp.float32)     # (1, F)
    w1 = params["w1"].astype(jnp.bfloat16)    # (F, H)
    b1 = params["b1"].astype(jnp.float32)     # (1, H)
    w2 = params["w2"]                         # (H, NC)
    b2 = params["b2"]                         # (1, NC)

    H = w1.shape[1]
    NC = w2.shape[1]
    NCP = max(128, pl.cdiv(NC, 128) * 128)    # lane-dense head width

    # Zero-pad the head (padded columns contribute zero logits; sliced off).
    w2p = jnp.zeros((H, NCP), jnp.bfloat16).at[:, :NC].set(w2.astype(jnp.bfloat16))
    b2p = jnp.zeros((1, NCP), jnp.float32).at[:, :NC].set(b2.astype(jnp.float32))

    TB = _choose_tb(B)
    TK = _choose_tk(F)
    nb = pl.cdiv(B, TB)
    nk = F // TK
    grid = (nb, nk)

    single = pl.Buffered(1)

    def spec(shape, index_map, *, single_buffer=False):
        if single_buffer:
            return pl.BlockSpec(shape, index_map, pipeline_mode=single)
        return pl.BlockSpec(shape, index_map)

    # K-streamed weights: default double-buffering while streaming over k;
    # single buffer when there is only one K slice (nothing to prefetch).
    k_stream_single = (nk == 1)

    in_specs = [
        spec((TB, TK), lambda i, k: (i, k)),                              # z_flat
        spec((TB, 3),  lambda i, k: (i, 0)),                              # coords
        spec((3, TK),  lambda i, k: (0, k), single_buffer=k_stream_single),  # we
        spec((1, TK),  lambda i, k: (0, k), single_buffer=k_stream_single),  # be
        spec((TK, H),  lambda i, k: (k, 0), single_buffer=k_stream_single),  # w1
        spec((1, H),   lambda i, k: (0, 0), single_buffer=True),          # b1
        spec((H, NCP), lambda i, k: (0, 0), single_buffer=True),          # w2 (padded)
        spec((1, NCP), lambda i, k: (0, 0), single_buffer=True),          # b2 (padded)
    ]
    out_spec = spec((TB, NCP), lambda i, k: (i, 0))

    # VMEM budget (approximate, with (8,128) tile padding) -> vmem_limit_bytes.
    r8 = lambda x: ((x + 7) // 8) * 8
    r128 = lambda x: ((x + 127) // 128) * 128
    kbuf = 1 if k_stream_single else 2
    bytes_needed = (
        2 * r8(TB) * r128(TK) * 4          # z stream, double-buffered, f32
        + 2 * r8(TB) * 128 * 4             # coords
        + kbuf * 8 * r128(TK) * 4          # we
        + kbuf * 8 * r128(TK) * 4          # be
        + kbuf * r8(TK) * r128(H) * 2      # w1
        + 8 * r128(H) * 4                  # b1 (single buffer)
        + r8(H) * NCP * 2                  # w2p (single buffer)
        + 8 * NCP * 4                      # b2p (single buffer)
        + 2 * r8(TB) * NCP * 4             # output, double-buffered
        + r8(TB) * r128(H) * 4             # accumulator scratch
    )
    vmem_limit = int(min(max(bytes_needed * 3 // 2, 32 * 2**20), 56 * 2**20))

    cost = pl.CostEstimate(
        flops=2 * B * (F * H + H * NCP) + 6 * B * F,
        transcendentals=0,
        bytes_accessed=(B * F * 4 + B * 3 * 4 + B * NCP * 4
                        + (3 * F + F + H + NCP) * 4
                        + (F * H + H * NCP) * 2),
    )

    out = pl.pallas_call(
        _classifier_kernel,
        out_shape=jax.ShapeDtypeStruct((B, NCP), jnp.float32),
        grid=grid,
        in_specs=in_specs,
        out_specs=out_spec,
        scratch_shapes=[pltpu.VMEM((TB, H), jnp.float32)],
        compiler_params=pltpu.CompilerParams(
            dimension_semantics=("parallel", "arbitrary"),
            vmem_limit_bytes=vmem_limit),
        cost_estimate=cost,
    )(z_flat, coords, we, be, w1, b1, w2p, b2p)

    return out[:, :NC]


def init_params(key, *, feat, hidden, n_classes):
    """Deterministic synthetic parameters (natural PyTorch-like shapes)."""
    k1, k2, k3, k4, k5, k6 = jax.random.split(key, 6)
    we = jax.random.normal(k1, (3, feat), jnp.float32) * 0.1
    be = jax.random.normal(k2, (1, feat), jnp.float32) * 0.01
    w1 = jax.random.normal(k3, (feat, hidden), jnp.float32) * (1.0 / feat ** 0.5)
    b1 = jax.random.normal(k4, (1, hidden), jnp.float32) * 0.01
    w2 = jax.random.normal(k5, (hidden, n_classes), jnp.float32) * (1.0 / hidden ** 0.5)
    b2 = jax.random.normal(k6, (1, n_classes), jnp.float32) * 0.01
    return dict(we=we, be=be, w1=w1, b1=b1, w2=w2, b2=b2)


def _reference_forward(z_atoms, x_coords, params):
    # Pure-JAX reference mirroring the kernel's mixed precision
    # (f32 residual add, bf16 MXU operands, f32 accumulation).
    B = z_atoms.shape[0]
    z = z_atoms.reshape(B, -1).astype(jnp.float32)
    zc = x_coords.astype(jnp.float32) @ params["we"].astype(jnp.float32) \
        + params["be"].astype(jnp.float32)
    h = (z + zc).astype(jnp.bfloat16)
    h1 = jnp.dot(h, params["w1"].astype(jnp.bfloat16),
                 preferred_element_type=jnp.float32) + params["b1"].astype(jnp.float32)
    h1 = jnp.maximum(h1, 0.0)
    logits = jnp.dot(h1.astype(jnp.bfloat16), params["w2"].astype(jnp.bfloat16),
                     preferred_element_type=jnp.float32) + params["b2"].astype(jnp.float32)
    return logits


if __name__ == "__main__":
    # Small shapes: batch=2, channels=4, 3D latent spatial=4 -> F = 4*4*4*4 = 256.
    B, C, D, Hs, Ws = 2, 4, 4, 4, 4
    FEAT = C * D * Hs * Ws          # 256
    HIDDEN = 128
    N_CLASSES = 20                  # 20 amino acids

    key = jax.random.PRNGKey(0)
    kz, kc, kp = jax.random.split(key, 3)

    z_atoms = jax.random.normal(kz, (B, C, D, Hs, Ws), jnp.float32)
    x_coords = jax.random.normal(kc, (B, 3), jnp.float32)
    params = init_params(kp, feat=FEAT, hidden=HIDDEN, n_classes=N_CLASSES)

    logits = coordinate_classifier_forward(z_atoms, x_coords, params)
    logits = jax.block_until_ready(logits)

    ref = _reference_forward(z_atoms, x_coords, params)
    assert logits.shape == (B, N_CLASSES)
    assert jnp.allclose(logits, ref, atol=2e-2, rtol=2e-2), "mismatch vs reference"

    print("KERNEL_OK")
</pallas_src>

<mosaic_0001>
module attributes {stable_mosaic.version = 11 : i64} {
  func.func @_classifier_kernel(%arg0: i32, %arg1: i32, %arg2: memref<2x256xf32, #tpu.memory_space<vmem>>, %arg3: memref<2x3xf32, #tpu.memory_space<vmem>>, %arg4: memref<3x256xf32, #tpu.memory_space<vmem>>, %arg5: memref<1x256xf32, #tpu.memory_space<vmem>>, %arg6: memref<256x128xbf16, #tpu.memory_space<vmem>>, %arg7: memref<1x128xf32, #tpu.memory_space<vmem>>, %arg8: memref<128x128xbf16, #tpu.memory_space<vmem>>, %arg9: memref<1x128xf32, #tpu.memory_space<vmem>>, %arg10: memref<2x128xf32, #tpu.memory_space<vmem>>, %arg11: memref<2x128xf32, #tpu.memory_space<vmem>>) attributes {dimension_semantics = [#tpu.dimension_semantics<parallel>, #tpu.dimension_semantics<arbitrary>], iteration_bounds = array<i64: 1, 1>, scalar_prefetch = 0 : i64, scratch_operands = 1 : i64, tpu.core_type = #tpu.core_type<tc>, window_params = [{transform_indices = @transform_0, window_bounds = array<i64: 2, 256>}, {transform_indices = @transform_1, window_bounds = array<i64: 2, 3>}, {pipeline_mode = #tpu.pipeline_mode<synchronous>, transform_indices = @transform_2, window_bounds = array<i64: 3, 256>}, {pipeline_mode = #tpu.pipeline_mode<synchronous>, transform_indices = @transform_3, window_bounds = array<i64: 1, 256>}, {pipeline_mode = #tpu.pipeline_mode<synchronous>, transform_indices = @transform_4, window_bounds = array<i64: 256, 128>}, {pipeline_mode = #tpu.pipeline_mode<synchronous>, transform_indices = @transform_5, window_bounds = array<i64: 1, 128>}, {pipeline_mode = #tpu.pipeline_mode<synchronous>, transform_indices = @transform_6, window_bounds = array<i64: 128, 128>}, {pipeline_mode = #tpu.pipeline_mode<synchronous>, transform_indices = @transform_7, window_bounds = array<i64: 1, 128>}, {transform_indices = @transform_8, window_bounds = array<i64: 2, 128>}]} {
    %c0_i32 = arith.constant 0 : i32
    %0 = arith.cmpi eq, %arg1, %c0_i32 : i32
    %1 = arith.extui %0 : i1 to i32
    %c0_i32_0 = arith.constant 0 : i32
    %2 = arith.cmpi ne, %1, %c0_i32_0 : i32
    scf.if %2 {
      %cst_16 = arith.constant 0.000000e+00 : f32
      %36 = vector.broadcast %cst_16 : f32 to vector<2x128xf32>
      %c0_17 = arith.constant 0 : index
      %c0_18 = arith.constant 0 : index
      %37 = vector.load %arg11[%c0_17, %c0_18] : memref<2x128xf32, #tpu.memory_space<vmem>>, vector<2x128xf32>
      tpu.vector_store %arg11[%c0_17, %c0_18], %36 {strides = array<i32>} : memref<2x128xf32, #tpu.memory_space<vmem>>, vector<2x128xf32>,
    } else {
    }
    %c0 = arith.constant 0 : index
    %c0_1 = arith.constant 0 : index
    %3 = vector.load %arg3[%c0, %c0_1] : memref<2x3xf32, #tpu.memory_space<vmem>>, vector<2x3xf32>
    %c0_2 = arith.constant 0 : index
    %c0_3 = arith.constant 0 : index
    %4 = vector.load %arg4[%c0_2, %c0_3] : memref<3x256xf32, #tpu.memory_space<vmem>>, vector<3x256xf32>
    %5 = vector.extract_strided_slice %3 {offsets = [0, 0], sizes = [2, 1], strides = [1, 1]} : vector<2x3xf32> to vector<2x1xf32>
    %6 = vector.extract_strided_slice %4 {offsets = [0, 0], sizes = [1, 256], strides = [1, 1]} : vector<3x256xf32> to vector<1x256xf32>
    %7 = vector.broadcast %5 : vector<2x1xf32> to vector<2x256xf32>
    %8 = vector.broadcast %6 : vector<1x256xf32> to vector<2x256xf32>
    %9 = arith.mulf %7, %8 : vector<2x256xf32>
    %10 = vector.extract_strided_slice %3 {offsets = [0, 1], sizes = [2, 1], strides = [1, 1]} : vector<2x3xf32> to vector<2x1xf32>
    %11 = vector.extract_strided_slice %4 {offsets = [1, 0], sizes = [1, 256], strides = [1, 1]} : vector<3x256xf32> to vector<1x256xf32>
    %12 = vector.broadcast %10 : vector<2x1xf32> to vector<2x256xf32>
    %13 = vector.broadcast %11 : vector<1x256xf32> to vector<2x256xf32>
    %14 = arith.mulf %12, %13 : vector<2x256xf32>
    %15 = arith.addf %9, %14 : vector<2x256xf32>
    %16 = vector.extract_strided_slice %3 {offsets = [0, 2], sizes = [2, 1], strides = [1, 1]} : vector<2x3xf32> to vector<2x1xf32>
    %17 = vector.extract_strided_slice %4 {offsets = [2, 0], sizes = [1, 256], strides = [1, 1]} : vector<3x256xf32> to vector<1x256xf32>
    %18 = vector.broadcast %16 : vector<2x1xf32> to vector<2x256xf32>
    %19 = vector.broadcast %17 : vector<1x256xf32> to vector<2x256xf32>
    %20 = arith.mulf %18, %19 : vector<2x256xf32>
    %21 = arith.addf %15, %20 : vector<2x256xf32>
    %c0_4 = arith.constant 0 : index
    %c0_5 = arith.constant 0 : index
    %22 = vector.load %arg5[%c0_4, %c0_5] : memref<1x256xf32, #tpu.memory_space<vmem>>, vector<1x256xf32>
    %23 = vector.broadcast %22 : vector<1x256xf32> to vector<2x256xf32>
    %24 = arith.addf %21, %23 : vector<2x256xf32>
    %c0_6 = arith.constant 0 : index
    %c0_7 = arith.constant 0 : index
    %25 = vector.load %arg2[%c0_6, %c0_7] : memref<2x256xf32, #tpu.memory_space<vmem>>, vector<2x256xf32>
    %26 = arith.addf %25, %24 : vector<2x256xf32>
    %27 = arith.truncf %26 : vector<2x256xf32> to vector<2x256xbf16>
    %c0_8 = arith.constant 0 : index
    %c0_9 = arith.constant 0 : index
    %28 = vector.load %arg11[%c0_8, %c0_9] : memref<2x128xf32, #tpu.memory_space<vmem>>, vector<2x128xf32>
    %c0_10 = arith.constant 0 : index
    %c0_11 = arith.constant 0 : index
    %29 = vector.load %arg6[%c0_10, %c0_11] : memref<256x128xbf16, #tpu.memory_space<vmem>>, vector<256x128xbf16>
    %cst = arith.constant dense<0.000000e+00> : vector<2x128xf32>
    %30 = tpu.matmul %27, %29, %cst {dimension_numbers = #tpu.dot_dimension_numbers<[1], [0], [0], [1], [0, 0, 1, 1], [], []>} : vector<2x256xbf16>, vector<256x128xbf16>, vector<2x128xf32> -> vector<2x128xf32>
    %31 = arith.addf %28, %30 : vector<2x128xf32>
    %c0_12 = arith.constant 0 : index
    %c0_13 = arith.constant 0 : index
    %32 = vector.load %arg11[%c0_12, %c0_13] : memref<2x128xf32, #tpu.memory_space<vmem>>, vector<2x128xf32>
    tpu.vector_store %arg11[%c0_12, %c0_13], %31 {strides = array<i32>} : memref<2x128xf32, #tpu.memory_space<vmem>>, vector<2x128xf32>,
    %c0_i32_14 = arith.constant 0 : i32
    %33 = arith.cmpi eq, %arg1, %c0_i32_14 : i32
    %34 = arith.extui %33 : i1 to i32
    %c0_i32_15 = arith.constant 0 : i32
    %35 = arith.cmpi ne, %34, %c0_i32_15 : i32
    scf.if %35 {
      %c0_16 = arith.constant 0 : index
      %c0_17 = arith.constant 0 : index
      %36 = vector.load %arg11[%c0_16, %c0_17] : memref<2x128xf32, #tpu.memory_space<vmem>>, vector<2x128xf32>
      %c0_18 = arith.constant 0 : index
      %c0_19 = arith.constant 0 : index
      %37 = vector.load %arg7[%c0_18, %c0_19] : memref<1x128xf32, #tpu.memory_space<vmem>>, vector<1x128xf32>
      %38 = vector.broadcast %37 : vector<1x128xf32> to vector<2x128xf32>
      %39 = arith.addf %36, %38 : vector<2x128xf32>
      %cst_20 = arith.constant 0.000000e+00 : f32
      %40 = vector.broadcast %cst_20 : f32 to vector<2x128xf32>
      %41 = arith.maximumf %39, %40 : vector<2x128xf32>
      %42 = arith.truncf %41 : vector<2x128xf32> to vector<2x128xbf16>
      %c0_21 = arith.constant 0 : index
      %c0_22 = arith.constant 0 : index
      %43 = vector.load %arg8[%c0_21, %c0_22] : memref<128x128xbf16, #tpu.memory_space<vmem>>, vector<128x128xbf16>
      %cst_23 = arith.constant dense<0.000000e+00> : vector<2x128xf32>
      %44 = tpu.matmul %42, %43, %cst_23 {dimension_numbers = #tpu.dot_dimension_numbers<[1], [0], [0], [1], [0, 0, 1, 1], [], []>} : vector<2x128xbf16>, vector<128x128xbf16>, vector<2x128xf32> -> vector<2x128xf32>
      %c0_24 = arith.constant 0 : index
      %c0_25 = arith.constant 0 : index
      %45 = vector.load %arg9[%c0_24, %c0_25] : memref<1x128xf32, #tpu.memory_space<vmem>>, vector<1x128xf32>
      %46 = vector.broadcast %45 : vector<1x128xf32> to vector<2x128xf32>
      %47 = arith.addf %44, %46 : vector<2x128xf32>
      %c0_26 = arith.constant 0 : index
      %c0_27 = arith.constant 0 : index
      %48 = vector.load %arg10[%c0_26, %c0_27] : memref<2x128xf32, #tpu.memory_space<vmem>>, vector<2x128xf32>
      tpu.vector_store %arg10[%c0_26, %c0_27], %47 {strides = array<i32>} : memref<2x128xf32, #tpu.memory_space<vmem>>, vector<2x128xf32>,
    } else {
    }
    return
  }
  func.func @transform_0(%arg0: i32, %arg1: i32) -> (i32, i32) {
    %c0_i32 = arith.constant 0 : i32
    return %arg0, %arg1 : i32, i32
  }
  func.func @transform_1(%arg0: i32, %arg1: i32) -> (i32, i32) {
    %c0_i32 = arith.constant 0 : i32
    %c0_i32_0 = arith.constant 0 : i32
    return %arg0, %c0_i32 : i32, i32
  }
  func.func @transform_2(%arg0: i32, %arg1: i32) -> (i32, i32) {
    %c0_i32 = arith.constant 0 : i32
    %c0_i32_0 = arith.constant 0 : i32
    return %c0_i32, %arg1 : i32, i32
  }
  func.func @transform_3(%arg0: i32, %arg1: i32) -> (i32, i32) {
    %c0_i32 = arith.constant 0 : i32
    %c0_i32_0 = arith.constant 0 : i32
    return %c0_i32, %arg1 : i32, i32
  }
  func.func @transform_4(%arg0: i32, %arg1: i32) -> (i32, i32) {
    %c0_i32 = arith.constant 0 : i32
    %c0_i32_0 = arith.constant 0 : i32
    return %arg1, %c0_i32 : i32, i32
  }
  func.func @transform_5(%arg0: i32, %arg1: i32) -> (i32, i32) {
    %c0_i32 = arith.constant 0 : i32
    %c0_i32_0 = arith.constant 0 : i32
    %c0_i32_1 = arith.constant 0 : i32
    return %c0_i32, %c0_i32_0 : i32, i32
  }
  func.func @transform_6(%arg0: i32, %arg1: i32) -> (i32, i32) {
    %c0_i32 = arith.constant 0 : i32
    %c0_i32_0 = arith.constant 0 : i32
    %c0_i32_1 = arith.constant 0 : i32
    return %c0_i32, %c0_i32_0 : i32, i32
  }
  func.func @transform_7(%arg0: i32, %arg1: i32) -> (i32, i32) {
    %c0_i32 = arith.constant 0 : i32
    %c0_i32_0 = arith.constant 0 : i32
    %c0_i32_1 = arith.constant 0 : i32
    return %c0_i32, %c0_i32_0 : i32, i32
  }
  func.func @transform_8(%arg0: i32, %arg1: i32) -> (i32, i32) {
    %c0_i32 = arith.constant 0 : i32
    %c0_i32_0 = arith.constant 0 : i32
    return %arg0, %c0_i32 : i32, i32
  }
}

</mosaic_0001>

<bundles_post_ra>
// kernel: tpu_custom_call.1
= control target key start
LH: loop header
LB: loop body
LE: loop exit
PB: predicated region body
PF: predicated region fallthrough
CT: control target
= control target key end

     0   :  { %13 = vsyncpa [#allocation4], 0  ;;  %s897_s0 = inlined_call_operand.hbm [shape: f32[2,256], index: 0, kind: input, shape index: {}]   ;;  %s898_s1 = inlined_call_operand.vmem [shape: f32[2,3], index: 1, kind: input, shape index: {}]   ;;  %s899_s2 = inlined_call_operand.hbm [shape: f32[3,256], index: 2, kind: input, shape index: {}]   ;;  %s900_s3 = inlined_call_operand.vmem [shape: f32[1,256], index: 3, kind: input, shape index: {}]   ;;  %s901_s4 = inlined_call_operand.hbm [shape: bf16[256,128], index: 4, kind: input, shape index: {}]   ;;  %s902_s5 = inlined_call_operand.vmem [shape: f32[1,128], index: 5, kind: input, shape index: {}]   ;;  %s903_s6 = inlined_call_operand.hbm [shape: bf16[128,128], index: 6, kind: input, shape index: {}]   ;;  %s904_s7 = inlined_call_operand.vmem [shape: f32[1,128], index: 7, kind: input, shape index: {}]   ;;  %s905_s8 = inlined_call_operand.hbm [shape: f32[2,128], index: 8, kind: output, shape index: {}]  }
   0x1   :  { %14 = vsyncpa [#allocation7], 0 }
   0x2   :  { %15 = vsyncpa [#allocation10], 0 }
   0x3   :  { %16 = vsyncpa [#allocation5], 0  ;;  %s757_s27 = smov [#allocation6]   ;;  %s758_s29 = smov [#allocation3]  }
   0x4   :  { %s35_s28 = sshll.u32 %s757_s27, 4  ;;  %s23_s30 = sshll.u32 %s758_s29, 4  ;;  %s36_s28 = int_to_ptr.vmem [resolvable:$true] %s35_s28  ;;  %s24_s30 = int_to_ptr.vmem [resolvable:$true] %s23_s30 }
   0x5   :  { %s639_s11 = scalar_lea.hbm %s899_s2, 128 }
   0x6   :  { %p640_p0 = scmp.ne.s32.totalorder %s899_s2, %s639_s11  ;;  %p643_p1 = scmp.lt.u32.totalorder %s639_s11, %s899_s2 }
   0x8   :  { %p645_p2 = pnand %p643_p1, %p640_p0 }
   0xa   :  { %648 = shalt.err (!%p645_p2)
}
   0xb   :  { %s649_s16 = scalar_lea.vmem %s36_s28, 128  ;;  %p654_p4 = scmp.lt.s32.totalorder %s36_s28, %s36_s28 }
   0xc   :  { %p650_p3 = scmp.ne.s32.totalorder %s36_s28, %s649_s16  ;;  %p655_p5 = scmp.lt.s32.totalorder %s649_s16, %s649_s16 }
   0xe   :  { %p656_p6 = por %p655_p5, %p654_p4 }
  0x10   :  { %p657_p7 = pnand %p656_p6, %p650_p3 }
  0x12   :  { %660 = shalt.err (!%p657_p7)
}
  0x13   :  { %38 = dma.hbm_to_vmem [thread:$0]  %s899_s2, 128, %s36_s28, [#allocation7]  }
  0x14   :  { %s661_s21 = scalar_lea.hbm %s897_s0, 64 }
  0x15   :  { %p662_p8 = scmp.ne.s32.totalorder %s897_s0, %s661_s21  ;;  %p665_p9 = scmp.lt.u32.totalorder %s661_s21, %s897_s0 }
  0x17   :  { %p667_p10 = pnand %p665_p9, %p662_p8 }
  0x19   :  { %670 = shalt.err (!%p667_p10)
}
  0x1a   :  { %s671_s26 = scalar_lea.vmem %s24_s30, 64  ;;  %p676_p12 = scmp.lt.s32.totalorder %s24_s30, %s24_s30 }
  0x1b   :  { %p672_p11 = scmp.ne.s32.totalorder %s24_s30, %s671_s26  ;;  %p677_p13 = scmp.lt.s32.totalorder %s671_s26, %s671_s26 }
  0x1d   :  { %p678_p0 = por %p677_p13, %p676_p12 }
  0x1f   :  { %p679_p1 = pnand %p678_p0, %p672_p11 }
  0x21   :  { %682 = shalt.err (!%p679_p1)
}
  0x22   :  { %26 = dma.hbm_to_vmem [thread:$0]  %s897_s0, 64, %s24_s30, [#allocation4]  }
  0x23   :  { %s759_s28 = smov [#allocation8]   ;;  %s683_s11 = scalar_lea.hbm %s901_s4, 2048 }
  0x24   :  { %s46_s29 = sshll.u32 %s759_s28, 4  ;;  %p684_p2 = scmp.ne.s32.totalorder %s901_s4, %s683_s11  ;;  %s47_s29 = int_to_ptr.vmem [resolvable:$true] %s46_s29 }
  0x25   :  { %p687_p3 = scmp.lt.u32.totalorder %s683_s11, %s901_s4 }
  0x27   :  { %p689_p4 = pnand %p687_p3, %p684_p2 }
  0x29   :  { %692 = shalt.err (!%p689_p4)
}
  0x2a   :  { %s693_s16 = scalar_lea.vmem %s47_s29, 2048  ;;  %p698_p6 = scmp.lt.s32.totalorder %s47_s29, %s47_s29 }
  0x2b   :  { %p694_p5 = scmp.ne.s32.totalorder %s47_s29, %s693_s16  ;;  %p699_p7 = scmp.lt.s32.totalorder %s693_s16, %s693_s16 }
  0x2d   :  { %p700_p8 = por %p699_p7, %p698_p6 }
  0x2f   :  { %p701_p9 = pnand %p700_p8, %p694_p5 }
  0x31   :  { %704 = shalt.err (!%p701_p9)
}
  0x32   :  { %s760_s0 = smov 64   ;;  %s761_s30 = smov 4  }
  0x33   :  { %52 = dma.hbm_to_vmem [thread:$0]  %s901_s4, 2048, %s47_s29, [#allocation7], %s760_s0, %s760_s0, %s761_s30  }
  0x34   :  { %s762_s19 = smov [#allocation9]   ;;  %s705_s23 = scalar_lea.hbm %s903_s6, 1024 }
  0x35   :  { %s60_s20 = sshll.u32 %s762_s19, 4  ;;  %p706_p10 = scmp.ne.s32.totalorder %s903_s6, %s705_s23  ;;  %s61_s20 = int_to_ptr.vmem [resolvable:$true] %s60_s20 }
  0x36   :  { %p709_p11 = scmp.lt.u32.totalorder %s705_s23, %s903_s6 }
  0x38   :  { %p711_p12 = pnand %p709_p11, %p706_p10 }
  0x3a   :  { %714 = shalt.err (!%p711_p12)
}
  0x3b   :  { %s715_s27 = scalar_lea.vmem %s61_s20, 1024  ;;  %p720_p0 = scmp.lt.s32.totalorder %s61_s20, %s61_s20 }
  0x3c   :  { %p716_p13 = scmp.ne.s32.totalorder %s61_s20, %s715_s27  ;;  %p721_p1 = scmp.lt.s32.totalorder %s715_s27, %s715_s27 }
  0x3e   :  { %p722_p2 = por %p721_p1, %p720_p0 }
  0x40   :  { %p723_p3 = pnand %p722_p2, %p716_p13 }
  0x42   :  { %726 = shalt.err (!%p723_p3)
}
  0x43   :  { %66 = dma.hbm_to_vmem [thread:$0]  %s903_s6, 1024, %s61_s20, [#allocation10], %s760_s0, %s760_s0, %s761_s30  }
  0x44   :  { %749 = dma.done.wait [#allocation4], 64  }
  0x45   :  { %750 = vsyncadd [#allocation4], 4294967232 }
  0x46   :  { %751 = dma.done.wait [#allocation7], 2176  }
  0x47   :  { %752 = vsyncadd [#allocation7], 4294965120 }
  0x48   :  { %753 = dma.done.wait [#allocation10], 1024  }
  0x49   :  { %754 = vsyncadd [#allocation10], 4294966272  ;;  %v763_v0 = vmov 0   ;;  %v764_v1 = vmov 2   ;;  %v87_v2 = vld [vmem:[%s898_s1] sm:$0x3]  ;;  %v95_v24 = vlaneseq }
  0x4a   :  { %611 = vset.pattern.permute.xlu0 %v763_v0  ;;  %613 = vset.pattern.permute.xlu1 %v764_v1  ;;  %v615_v3 = vld [vmem:[#allocation8 + $0x40] sm:$0xff]   ;;  %v617_v5 = vld [vmem:[#allocation8 + $0x48] sm:$0xff]   ;;  %v765_v7 = vmov 1   ;;  %v619_v8 = vld [vmem:[#allocation8 + $0x50] sm:$0xff]   ;;  %v766_v21 = vmov 0.0   ;;  %vm768_vm0 = vmmov 0  }
  0x4b   :  { %91 = vperm.xlu0 %611, %v87_v2   ;;  %142 = vperm.xlu1 %613, %v87_v2   ;;  %v616_v4 = vld [vmem:[#allocation8] sm:$0xff]   ;;  %v618_v6 = vld [vmem:[#allocation8 + $0x8] sm:$0xff]   ;;  %v620_v9 = vld [vmem:[#allocation8 + $0x10] sm:$0xff]   ;;  %86 = vst [vmem:[#allocation2] sm:$0x3] %v766_v21  ;;  %v96_v25 = vshrl.u32 %v95_v24, 7 }
  0x4c   :  { %547 = vmatprep.subr.bf16.mxu0 %v615_v3  ;;  %v621_v10 = vld [vmem:[#allocation8 + $0x58] sm:$0xff]   ;;  %v623_v12 = vld [vmem:[#allocation8 + $0x60] sm:$0xff]   ;;  %v625_v14 = vld [vmem:[#allocation8 + $0x68] sm:$0xff]   ;;  %578 = vmatprep.subr.bf16.mxu1 %v766_v21  ;;  %v767_v48 = vmov 1983009808   ;;  %s769_s13 = smov [#allocation11]  }
  0x4d   :  { %548 = vmatpush3.bf16.msra.mxu0 %v616_v4  ;;  %v622_v11 = vld [vmem:[#allocation8 + $0x18] sm:$0xff]   ;;  %v624_v13 = vld [vmem:[#allocation8 + $0x20] sm:$0xff]   ;;  %v626_v15 = vld [vmem:[#allocation8 + $0x28] sm:$0xff]   ;;  %v97_v26 = vsub.s32 0, %v96_v25  ;;  %v101_v27 = vsub.s32 4, %v96_v25  ;;  %v121_v29 = vsub.s32 1, %v96_v25  ;;  %v186_v49 = vunpack.c.l.s4 %v767_v48  ;;  %594 = vmatprep.mubr.msk.bf16.mxu1 %vm768_vm0, %v766_v21 }
  0x4e   :  { %549 = vmatprep.subr.bf16.mxu0 %v617_v5  ;;  %v627_v16 = vld [vmem:[#allocation8 + $0x70] sm:$0xff]   ;;  %v629_v18 = vld [vmem:[#allocation8 + $0x78] sm:$0xff]   ;;  %v631_v19 = vld [vmem:[#allocation9] sm:$0xff]   ;;  %v125_v30 = vsub.s32 5, %v96_v25  ;;  %v147_v31 = vsub.s32 2, %v96_v25  ;;  %v151_v32 = vsub.s32 6, %v96_v25 }
  0x4f   :  { %612 = vset.pattern.permute.xlu0 %v765_v7  ;;  %v628_v17 = vld [vmem:[#allocation8 + $0x30] sm:$0xff]   ;;  %v630_v20 = vld [vmem:[#allocation8 + $0x38] sm:$0xff]   ;;  %579 = vmatpush3.bf16.msra.mxu1 %v631_v19  ;;  %v632_v22 = vld [vmem:[#allocation9 + $0x8] sm:$0xff]   ;;  %v187_v61 = vunpack.c.0.s8 %v186_v49  ;;  %s510_s14 = sshll.u32 %s769_s13, 4  ;;  %s511_s14 = int_to_ptr.vmem [resolvable:$true] %s510_s14 }
  0x50   :  { %116 = vperm.xlu0 %612, %v87_v2   ;;  %580 = vmatprep.subr.bf16.mxu1 %v766_v21  ;;  %v633_v23 = vld [vmem:[#allocation9 + $0x10] sm:$0xff]   ;;  %v88_v28 = vld [vmem:[#allocation6] sm:$0x77]  ;;  %s727_s15 = scalar_lea.vmem %s511_s14, 32  ;;  %p732_p5 = scmp.lt.s32.totalorder %s511_s14, %s511_s14 }
  0x51   :  { %550 = vmatpush3.bf16.msra.mxu0 %v618_v6  ;;  %v98_v33 = vrot.slane %v88_v28, %v97_v26  ;;  %v102_v34 = vrot.slane %v88_v28, %v101_v27  ;;  %v122_v35 = vrot.slane %v88_v28, %v121_v29  ;;  %v126_v36 = vrot.slane %v88_v28, %v125_v30  ;;  %v167_v47 = vld [vmem:[%s900_s3] sm:$0x3]  ;;  %v181_v4 = vld [vmem:[#allocation3] sm:$0xf]  ;;  %p728_p4 = scmp.ne.s32.totalorder %s511_s14, %s727_s15  ;;  %p733_p6 = scmp.lt.s32.totalorder %s727_s15, %s727_s15 }
  0x52   :  { %551 = vmatprep.subr.bf16.mxu0 %v619_v8  ;;  %v148_v37 = vrot.slane %v88_v28, %v147_v31  ;;  %v152_v38 = vrot.slane %v88_v28, %v151_v32  ;;  %v172_v57 = vrot.slane %v167_v47, %v97_v26  ;;  %v176_v60 = vrot.slane %v167_v47, %v121_v29  ;;  %v537_v24 = vld [vmem:[%s902_s5] ss:$0 sm:$0xff] }
  0x53   :  { %581 = vmatpush3.bf16.msra.mxu1 %v632_v22  ;;  %v108_v40 = vrot.slane %v98_v33, %v97_v26  ;;  %v112_v41 = vrot.slane %v102_v34, %v97_v26  ;;  %v132_v42 = vrot.slane %v122_v35, %v121_v29  ;;  %v136_v43 = vrot.slane %v126_v36, %v121_v29  ;;  %p734_p7 = por %p733_p6, %p732_p5 }
  0x54   :  { %614 = vset.pattern.permute.xlu0 %v764_v1  ;;  %582 = vmatprep.subr.bf16.mxu1 %v766_v21  ;;  %v158_v44 = vrot.slane %v148_v37, %v147_v31  ;;  %v162_v45 = vrot.slane %v152_v38, %v147_v31  ;;  %v190_v2 = vsub.s32 %v187_v61, %v96_v25 }
  0x55   :  { %552 = vmatpush3.bf16.msra.mxu0 %v620_v9  ;;  %p735_p8 = pnand %p734_p7, %p728_p4 }
  0x56   :  { %553 = vmatprep.subr.bf16.mxu0 %v621_v10 }
  0x57   :  { %583 = vmatpush3.bf16.msra.mxu1 %v633_v23 }
  0x58   :  { %584 = vmatprep.subr.bf16.mxu1 %v766_v21 }
  0x59   :  { %554 = vmatpush3.bf16.msra.mxu0 %v622_v11  ;;  %v634_v11 = vld [vmem:[#allocation9 + $0x18] sm:$0xff]  }
  0x5a   :  { %555 = vmatprep.subr.bf16.mxu0 %v623_v12  ;;  %v635_v12 = vld [vmem:[#allocation9 + $0x20] sm:$0xff]  }
  0x5b   :  { %585 = vmatpush3.bf16.msra.mxu1 %v634_v11 }
  0x5c   :  { %586 = vmatprep.subr.bf16.mxu1 %v766_v21 }
  0x5d   :  { %556 = vmatpush3.bf16.msra.mxu0 %v624_v13  ;;  %v636_v13 = vld [vmem:[#allocation9 + $0x28] sm:$0xff]  }
  0x5e   :  { %557 = vmatprep.subr.bf16.mxu0 %v625_v14  ;;  %v637_v14 = vld [vmem:[#allocation9 + $0x30] sm:$0xff]  }
  0x5f   :  { %587 = vmatpush3.bf16.msra.mxu1 %v635_v12 }
  0x60   :  { %588 = vmatprep.subr.bf16.mxu1 %v766_v21 }
  0x61   :  { %558 = vmatpush3.bf16.msra.mxu0 %v626_v15  ;;  %v638_v15 = vld [vmem:[#allocation9 + $0x38] sm:$0xff]  }
  0x62   :  { %559 = vmatprep.subr.bf16.mxu0 %v627_v16 }
  0x63   :  { %589 = vmatpush3.bf16.msra.mxu1 %v636_v13 }
  0x64   :  { %590 = vmatprep.subr.bf16.mxu1 %v766_v21 }
  0x65   :  { %560 = vmatpush3.bf16.msra.mxu0 %v628_v17  ;;  %v207_v17 = vld [vmem:[#allocation2] sm:$0x3] }
  0x66   :  { %561 = vmatprep.subr.bf16.mxu0 %v629_v18 }
  0x67   :  { %591 = vmatpush3.bf16.msra.mxu1 %v637_v14 }
  0x68   :  { %592 = vmatprep.subr.bf16.mxu1 %v766_v21  ;;  %v538_v21 = vld [vmem:[%s904_s7] ss:$0 sm:$0xff] }
  0x69   :  { %562 = vmatpush3.bf16.msra.mxu0 %v630_v20 }
  0x6b   :  { %593 = vmatpush3.bf16.msra.mxu1 %v638_v15 }
  0xca   :  { %v92_v39 = vpop.permute.xlu0 %91  ;;  %v143_v46 = vpop.permute.xlu1 %142 }
  0xcb   :  { %v113_v50 = vmul.f32 %v108_v40, %v92_v39  ;;  %v114_v51 = vmul.f32 %v112_v41, %v92_v39  ;;  %v163_v55 = vmul.f32 %v158_v44, %v143_v46  ;;  %v164_v56 = vmul.f32 %v162_v45, %v143_v46 }
  0xcf   :  { %v117_v52 = vpop.permute.xlu0 %116 }
  0xd0   :  { %v137_v53 = vmul.f32 %v132_v42, %v117_v52  ;;  %v138_v54 = vmul.f32 %v136_v43, %v117_v52 }
  0xd2   :  { %v139_v58 = vadd.f32 %v137_v53, %v113_v50  ;;  %v140_v59 = vadd.f32 %v138_v54, %v114_v51 }
  0xd4   :  { %v165_v62 = vadd.f32 %v163_v55, %v139_v58  ;;  %v166_v63 = vadd.f32 %v164_v56, %v140_v59 }
  0xd6   :  { %v179_v0 = vadd.f32 %v172_v57, %v165_v62  ;;  %v180_v1 = vadd.f32 %v176_v60, %v166_v63 }
  0xd8   :  { %v184_v3 = vcombine.low %v179_v0, %v180_v1 }
  0xda   :  { %v191_v5 = vrot.slane %v184_v3, %v190_v2 }
  0xdc   :  { %v193_v6 = vadd.f32 %v191_v5, %v181_v4 }
  0xde   :  { %v201_v7 = vrot.slane %v193_v6, %v190_v2 }
  0xe0   :  { %v202_v8 = vcombine.high %v201_v7, %v201_v7  ;;  %v205_v10 = vpack.c.bf16 %v201_v7, %v201_v7 }
  0xe2   :  { %v206_v9 = vpack.c.bf16 %v202_v8, %v202_v8 }
  0xe4   :  { %368 = vmatprep.mubr.bf16.mxu0 %v206_v9 }
  0xe5   :  { %369 = vmatmul.mubr.bf16.vlgmr.msra.gmra.mrb[0].mxu0 %v205_v10 }
 0x1b8   :  { %v563_v16 = vpop.f32.mrb[0].mxu0 }
 0x1b9   :  { %v564_v18 = vpop.f32.mrb[1].mxu0 }
 0x1ba   :  { %v565_v19 = vadd.f32 %v564_v18, %v563_v16  ;;  %v566_v20 = vpop.f32.mrb[2].mxu0 }
 0x1bb   :  { %v567_v22 = vpop.f32.mrb[3].mxu0 }
 0x1bc   :  { %v376_v23 = vadd.f32 %v565_v19, %v207_v17 }
 0x1be   :  { %377 = vst [vmem:[#allocation2] sm:$0x3] %v376_v23 }
 0x1c5   :  { %v381_v25 = vld [vmem:[#allocation2] sm:$0x3] }
 0x1c6   :  { %v389_v26 = vadd.f32 %v537_v24, %v381_v25 }
 0x1c8   :  { %v390_v27 = vmax.f32 %v389_v26, 0.0 }
 0x1ca   :  { %v391_v28 = vpack.c.bf16 %v390_v27, %v390_v27 }
 0x1cc   :  { %595 = vmatmul.mubr.bf16.vlgmr.msra.gmra.mrb[0].mxu1 %v391_v28 }
 0x29f   :  { %v497_v29 = vpop.f32.mrb[0].mxu1 }
 0x2a0   :  { %v498_v30 = vadd.f32 %v538_v21, %v497_v29  ;;  %v596_v31 = vpop.f32.mrb[1].mxu1 }
 0x2a1   :  { %v500_v32 = vpop.f32.mrb[2].mxu1 }
 0x2a2   :  { %503 = vst [vmem:[#allocation11] sm:$0x3] %v498_v30  ;;  %v597_v33 = vpop.f32.mrb[3].mxu1 }
 0x2a3   :  { %738 = shalt.err (!%p735_p8)
}
 0x2a4   :  { %s739_s7 = scalar_lea.hbm %s905_s8, 32 }
 0x2a5   :  { %p740_p9 = scmp.ne.s32.totalorder %s905_s8, %s739_s7  ;;  %p743_p10 = scmp.lt.u32.totalorder %s739_s7, %s905_s8 }
 0x2a7   :  { %p745_p11 = pnand %p743_p10, %p740_p9 }
 0x2a9   :  { %748 = shalt.err (!%p745_p11)
}
 0x2aa   :  { %513 = dma.vmem_to_hbm [thread:$0]  %s511_s14, 32, %s905_s8, [#allocation5]  }
 0x2ab   :  { %755 = dma.done.wait [#allocation5], 32  }
 0x2ac   :  { %756 = vsyncadd [#allocation5], 4294967264 }
 0x2ad   :  { %517 = vsyncpa [#allocation4], 1 }
 0x2ae   :  { %518 = vsyncpa [#allocation7], 1 }
 0x2af   :  { %519 = vsyncpa [#allocation10], 1 }
 0x2b0   :  { %520 = vsyncpa [#allocation5], 1 }

</bundles_post_ra>
